<compile_context>
chip_gen: v6e
topology: v6e:2x2x1
jax: 0.10.0
libtpu: 0.0.40
codegen_flags: <defaults>
</compile_context>

<pallas_src>
import functools

import jax
import jax.numpy as jnp
from jax.experimental import pallas as pl
from jax.experimental.pallas import tpu as pltpu


# ----------------------------- helpers -------------------------------------

def _pick_tile(dim, candidates):
    """Largest candidate tile that evenly divides dim, else the full dim."""
    for c in candidates:
        if dim % c == 0:
            return c
    return dim


_SQRT1_2 = 0.7071067811865476


def _erf_approx(x):
    # Abramowitz & Stegun 7.1.26, |err| <= 1.5e-7 -- "exact" gelu at f32/bf16
    # matmul noise level, built only from exp/mul/add (safe Mosaic lowering).
    p = 0.3275911
    a1, a2, a3, a4, a5 = 0.254829592, -0.284496736, 1.421413741, -1.453152027, 1.061405429
    ax = jnp.abs(x)
    t = 1.0 / (1.0 + p * ax)
    poly = ((((a5 * t + a4) * t + a3) * t + a2) * t + a1) * t
    r = 1.0 - poly * jnp.exp(-(ax * ax))
    return jnp.where(x >= 0.0, r, -r)


def _gelu_exact(x):
    return 0.5 * x * (1.0 + _erf_approx(x * _SQRT1_2))


# ----------------------------- Pallas kernels ------------------------------

def _linear_kernel(x_ref, w_ref, b_ref, o_ref, acc_ref, *, activation, transpose_rhs):
    @pl.when(pl.program_id(2) == 0)
    def _():
        acc_ref[...] = jnp.zeros_like(acc_ref)

    w = w_ref[...]
    if transpose_rhs:
        w = w.T
    acc_ref[...] += jnp.dot(x_ref[...], w, preferred_element_type=jnp.float32)

    @pl.when(pl.program_id(2) == pl.num_programs(2) - 1)
    def _():
        y = acc_ref[...] + b_ref[...]
        if activation == "gelu":
            y = _gelu_exact(y)
        o_ref[...] = y.astype(o_ref.dtype)


def linear(x, w, b, *, activation=None, transpose_rhs=False):
    """x:(M,K) @ w:(K,N) (or w:(N,K) if transpose_rhs) + b:(N,), bf16 MXU, f32 acc."""
    M, K = x.shape
    N = w.shape[0] if transpose_rhs else w.shape[1]
    tm = _pick_tile(M, (256, 128))
    tn = _pick_tile(N, (512, 256, 128))
    tk = _pick_tile(K, (512, 256, 128))

    if transpose_rhs:
        w_spec = pl.BlockSpec((tn, tk), lambda i, j, k: (j, k))
    else:
        w_spec = pl.BlockSpec((tk, tn), lambda i, j, k: (k, j))

    kernel = functools.partial(_linear_kernel, activation=activation,
                               transpose_rhs=transpose_rhs)
    return pl.pallas_call(
        kernel,
        out_shape=jax.ShapeDtypeStruct((M, N), jnp.float32),
        grid=(M // tm, N // tn, K // tk),
        in_specs=[
            pl.BlockSpec((tm, tk), lambda i, j, k: (i, k)),
            w_spec,
            pl.BlockSpec((1, tn), lambda i, j, k: (0, j)),
        ],
        out_specs=pl.BlockSpec((tm, tn), lambda i, j, k: (i, j)),
        scratch_shapes=[pltpu.VMEM((tm, tn), jnp.float32)],
        compiler_params=pltpu.CompilerParams(
            dimension_semantics=("parallel", "parallel", "arbitrary"),
            vmem_limit_bytes=32 * 1024 * 1024),
    )(x.astype(jnp.bfloat16), w.astype(jnp.bfloat16),
      b.reshape(1, N).astype(jnp.float32))


def _ln_kernel(x_ref, g_ref, b_ref, o_ref):
    x = x_ref[...]
    mean = jnp.mean(x, axis=-1, keepdims=True)
    xc = x - mean
    var = jnp.mean(xc * xc, axis=-1, keepdims=True)
    o_ref[...] = xc * jax.lax.rsqrt(var + 1e-5) * g_ref[...] + b_ref[...]


def _add_ln_kernel(x_ref, r_ref, g_ref, b_ref, o_ref):
    x = x_ref[...] + r_ref[...]           # fused residual add
    mean = jnp.mean(x, axis=-1, keepdims=True)
    xc = x - mean
    var = jnp.mean(xc * xc, axis=-1, keepdims=True)
    o_ref[...] = xc * jax.lax.rsqrt(var + 1e-5) * g_ref[...] + b_ref[...]


def _ln_call(kernel, arrays, g, b):
    shp = arrays[0].shape
    D = shp[-1]
    flats = [a.reshape(-1, D) for a in arrays]
    M = flats[0].shape[0]
    tm = _pick_tile(M, (256, 128))
    row_spec = pl.BlockSpec((tm, D), lambda i: (i, 0))
    vec_spec = pl.BlockSpec((1, D), lambda i: (0, 0))
    out = pl.pallas_call(
        kernel,
        out_shape=jax.ShapeDtypeStruct((M, D), jnp.float32),
        grid=(M // tm,),
        in_specs=[row_spec] * len(flats) + [vec_spec, vec_spec],
        out_specs=row_spec,
        compiler_params=pltpu.CompilerParams(dimension_semantics=("parallel",)),
    )(*flats, g.reshape(1, D), b.reshape(1, D))
    return out.reshape(shp)


def layernorm(x, g, b):
    return _ln_call(_ln_kernel, [x], g, b)


def add_layernorm(x, residual, g, b):
    """LayerNorm(x + residual), eps=1e-5 (torch default)."""
    return _ln_call(_add_ln_kernel, [x, residual], g, b)


def _attn_kernel(q_ref, k_ref, v_ref, kbias_ref, cbias_ref, o_ref, *, scale):
    q = q_ref[0]            # (H, Sq, Dh) bf16
    k = k_ref[0]            # (H, Sk, Dh) bf16
    v = v_ref[0]            # (H, Sk, Dh) bf16
    kb = kbias_ref[0]       # (1, Sk)  f32 additive key-padding bias
    cb = cbias_ref[0]       # (Sq, Sk) f32 additive causal bias
    s = jnp.einsum("hqd,hkd->hqk", q, k,
                   preferred_element_type=jnp.float32) * scale
    s = s + kb + cb          # broadcast over heads / queries inside the kernel
    m = jnp.max(s, axis=-1, keepdims=True)
    p = jnp.exp(s - m)
    p = p * pl.reciprocal(jnp.sum(p, axis=-1, keepdims=True), approx=True)
    o = jnp.einsum("hqk,hkd->hqd", p.astype(v.dtype), v,
                   preferred_element_type=jnp.float32)
    o_ref[0] = o.astype(o_ref.dtype)


def attn_pallas(q, k, v, key_bias, causal_bias, scale):
    """q,k,v: (B, H, S, Dh); key_bias: (B,1,Sk); causal_bias: (1,Sq,Sk)."""
    B, H, Sq, Dh = q.shape
    Sk = k.shape[2]
    # TODO(synk): for long sequences convert to a flash-style Sk-tiled loop with
    # running max/sum scratch instead of the full (Sq,Sk) score block.
    kernel = functools.partial(_attn_kernel, scale=scale)
    return pl.pallas_call(
        kernel,
        out_shape=jax.ShapeDtypeStruct((B, H, Sq, Dh), jnp.float32),
        grid=(B,),
        in_specs=[
            pl.BlockSpec((1, H, Sq, Dh), lambda b: (b, 0, 0, 0)),
            pl.BlockSpec((1, H, Sk, Dh), lambda b: (b, 0, 0, 0)),
            pl.BlockSpec((1, H, Sk, Dh), lambda b: (b, 0, 0, 0)),
            pl.BlockSpec((1, 1, Sk), lambda b: (b, 0, 0)),
            pl.BlockSpec((1, Sq, Sk), lambda b: (0, 0, 0)),
        ],
        out_specs=pl.BlockSpec((1, H, Sq, Dh), lambda b: (b, 0, 0, 0)),
        compiler_params=pltpu.CompilerParams(
            dimension_semantics=("parallel",),
            vmem_limit_bytes=32 * 1024 * 1024),
    )(q.astype(jnp.bfloat16), k.astype(jnp.bfloat16), v.astype(jnp.bfloat16),
      key_bias.astype(jnp.float32), causal_bias.astype(jnp.float32))


# ----------------------------- model blocks --------------------------------

def self_attention(x, key_bias, causal_bias, lp, H):
    B, S, D = x.shape
    Dh = D // H
    qkv = linear(x.reshape(B * S, D), lp["self_qkv_w"], lp["self_qkv_b"])   # (B*S, 3D)
    qkv = qkv.reshape(B, S, 3, H, Dh).transpose(2, 0, 3, 1, 4)              # (3,B,H,S,Dh)
    q, k, v = qkv[0], qkv[1], qkv[2]
    o = attn_pallas(q, k, v, key_bias, causal_bias, Dh ** -0.5)             # (B,H,S,Dh)
    o = o.transpose(0, 2, 1, 3).reshape(B * S, D)
    return linear(o, lp["self_o_w"], lp["self_o_b"]).reshape(B, S, D)


def cross_attention(x_q, x_kv, key_bias, zero_causal, lp, H):
    B, Sq, D = x_q.shape
    Sk = x_kv.shape[1]
    Dh = D // H
    q = linear(x_q.reshape(B * Sq, D), lp["cross_q_w"], lp["cross_q_b"])
    kv = linear(x_kv.reshape(B * Sk, D), lp["cross_kv_w"], lp["cross_kv_b"])  # (B*Sk, 2D)
    q = q.reshape(B, Sq, H, Dh).transpose(0, 2, 1, 3)
    kv = kv.reshape(B, Sk, 2, H, Dh).transpose(2, 0, 3, 1, 4)
    k, v = kv[0], kv[1]
    o = attn_pallas(q, k, v, key_bias, zero_causal, Dh ** -0.5)
    o = o.transpose(0, 2, 1, 3).reshape(B * Sq, D)
    return linear(o, lp["cross_o_w"], lp["cross_o_b"]).reshape(B, Sq, D)


def ffn(x, lp):
    B, S, D = x.shape
    h = linear(x.reshape(B * S, D), lp["fc1_w"], lp["fc1_b"], activation="gelu")
    h = linear(h, lp["fc2_w"], lp["fc2_b"])
    return h.reshape(B, S, D)


def encoder_layer(x, key_bias, zero_causal, lp, H):
    x = add_layernorm(x, self_attention(x, key_bias, zero_causal, lp, H),
                      lp["sa_ln_w"], lp["sa_ln_b"])
    x = add_layernorm(x, ffn(x, lp), lp["final_ln_w"], lp["final_ln_b"])
    return x


def decoder_layer(y, enc_out, dec_key_zero, causal, enc_key_bias, zero_causal_de, lp, H):
    y = add_layernorm(y, self_attention(y, dec_key_zero, causal, lp, H),
                      lp["sa_ln_w"], lp["sa_ln_b"])
    y = add_layernorm(y, cross_attention(y, enc_out, enc_key_bias, zero_causal_de, lp, H),
                      lp["ca_ln_w"], lp["ca_ln_b"])
    y = add_layernorm(y, ffn(y, lp), lp["final_ln_w"], lp["final_ln_b"])
    return y


def bart_forward(params, input_ids, labels, cfg):
    B, S_e = input_ids.shape
    S_d = labels.shape[1]
    D, H, V = cfg["d_model"], cfg["num_heads"], cfg["vocab_size"]
    pad = cfg["pad_token_id"]
    neg = jnp.finfo(jnp.float32).min

    # attention_mask = input_ids.ne(pad_token_id).float()
    attention_mask = (input_ids != pad).astype(jnp.float32)                 # (B, Se)

    # decoder_input_ids = shift_tokens_right(labels, pad, decoder_start)
    dec_in = jnp.concatenate(
        [jnp.full((B, 1), cfg["decoder_start_token_id"], labels.dtype), labels[:, :-1]],
        axis=1)
    dec_in = jnp.where(dec_in == -100, pad, dec_in)

    # compact additive masks (broadcast over heads/queries inside the kernel):
    enc_key_bias = ((1.0 - attention_mask) * neg).reshape(B, 1, S_e)        # (B,1,Se)
    dec_key_zero = jnp.zeros((B, 1, S_d), jnp.float32)                      # no dec padding mask (HF default)
    causal = jnp.where(jnp.tril(jnp.ones((S_d, S_d), dtype=bool)), 0.0, neg)[None]  # (1,Sd,Sd)
    no_causal_ee = jnp.zeros((1, S_e, S_e), jnp.float32)
    no_causal_de = jnp.zeros((1, S_d, S_e), jnp.float32)

    emb = params["shared"]

    # ---- encoder ----
    x = jnp.take(emb, input_ids, axis=0)
    x = x + jnp.take(params["enc_pos"], jnp.arange(S_e) + 2, axis=0)[None]  # offset 2
    x = layernorm(x, params["enc_ln_emb_w"], params["enc_ln_emb_b"])
    for lp in params["enc_layers"]:
        x = encoder_layer(x, enc_key_bias, no_causal_ee, lp, H)
    enc_out = x

    # ---- decoder ----
    y = jnp.take(emb, dec_in, axis=0)
    y = y + jnp.take(params["dec_pos"], jnp.arange(S_d) + 2, axis=0)[None]
    y = layernorm(y, params["dec_ln_emb_w"], params["dec_ln_emb_b"])
    for lp in params["dec_layers"]:
        y = decoder_layer(y, enc_out, dec_key_zero, causal, enc_key_bias, no_causal_de, lp, H)

    # ---- LM head tied to shared embedding (no emb.T materialization) ----
    logits = linear(y.reshape(B * S_d, D), emb, params["final_logits_bias"],
                    transpose_rhs=True).reshape(B, S_d, V)

    # ---- cross entropy (ignore_index=-100, mean reduction) ----
    logits_f = logits.reshape(-1, V)
    labels_f = labels.reshape(-1)
    valid = (labels_f != -100).astype(jnp.float32)
    logz = jax.nn.logsumexp(logits_f, axis=-1)
    picked = jnp.take_along_axis(logits_f, jnp.clip(labels_f, 0)[:, None], axis=-1)[:, 0]
    loss = jnp.sum((logz - picked) * valid) / jnp.sum(valid)
    return {"loss": loss, "logits": logits}


# ----------------------------- parameter init ------------------------------

def init_params(key, cfg):
    D, V, F = cfg["d_model"], cfg["vocab_size"], cfg["ffn_dim"]
    maxpos = cfg["max_position_embeddings"]
    keys = iter(jax.random.split(key, 64))

    def nrm(shape):  # BART init: normal(0, init_std=0.02), biases zero
        return 0.02 * jax.random.normal(next(keys), shape, jnp.float32)

    def layer_params(cross):
        p = {
            "self_qkv_w": nrm((D, 3 * D)),          # fused Q/K/V projection
            "self_qkv_b": jnp.zeros((3 * D,), jnp.float32),
            "self_o_w": nrm((D, D)),
            "self_o_b": jnp.zeros((D,), jnp.float32),
            "sa_ln_w": jnp.ones((D,), jnp.float32),
            "sa_ln_b": jnp.zeros((D,), jnp.float32),
        }
        if cross:
            p.update({
                "cross_q_w": nrm((D, D)),
                "cross_q_b": jnp.zeros((D,), jnp.float32),
                "cross_kv_w": nrm((D, 2 * D)),       # fused K/V projection
                "cross_kv_b": jnp.zeros((2 * D,), jnp.float32),
                "cross_o_w": nrm((D, D)),
                "cross_o_b": jnp.zeros((D,), jnp.float32),
                "ca_ln_w": jnp.ones((D,), jnp.float32),
                "ca_ln_b": jnp.zeros((D,), jnp.float32),
            })
        p.update({
            "fc1_w": nrm((D, F)),
            "fc1_b": jnp.zeros((F,), jnp.float32),
            "fc2_w": nrm((F, D)),
            "fc2_b": jnp.zeros((D,), jnp.float32),
            "final_ln_w": jnp.ones((D,), jnp.float32),
            "final_ln_b": jnp.zeros((D,), jnp.float32),
        })
        return p

    shared = nrm((V, D)).at[cfg["pad_token_id"]].set(0.0)   # padding_idx row zeroed
    return {
        "shared": shared,
        "enc_pos": nrm((maxpos + 2, D)),   # BartLearnedPositionalEmbedding offset=2
        "dec_pos": nrm((maxpos + 2, D)),
        "enc_ln_emb_w": jnp.ones((D,), jnp.float32),
        "enc_ln_emb_b": jnp.zeros((D,), jnp.float32),
        "dec_ln_emb_w": jnp.ones((D,), jnp.float32),
        "dec_ln_emb_b": jnp.zeros((D,), jnp.float32),
        "final_logits_bias": jnp.zeros((V,), jnp.float32),
        "enc_layers": [layer_params(False) for _ in range(cfg["encoder_layers"])],
        "dec_layers": [layer_params(True) for _ in range(cfg["decoder_layers"])],
    }


# --------------------------------- main -------------------------------------

if __name__ == "__main__":
    cfg = dict(
        vocab_size=64,
        d_model=32,
        num_heads=4,
        ffn_dim=64,
        encoder_layers=2,
        decoder_layers=2,
        max_position_embeddings=32,
        pad_token_id=3,
        decoder_start_token_id=1,
    )
    B, S = 2, 8

    root = jax.random.PRNGKey(0)
    k_params, k_in, k_lab = jax.random.split(root, 3)
    params = init_params(k_params, cfg)

    input_ids = jax.random.randint(k_in, (B, S), 4, cfg["vocab_size"], dtype=jnp.int32)
    input_ids = input_ids.at[1, 6:].set(cfg["pad_token_id"])   # some padding
    labels = jax.random.randint(k_lab, (B, S), 4, cfg["vocab_size"], dtype=jnp.int32)

    # TODO(synk): beam-search `generate()` (repetition penalty, no-repeat ngrams)
    # is host-side decode logic, not a kernel; only the forward pass is implemented.
    out = bart_forward(params, input_ids, labels, cfg)
    jax.block_until_ready(out)
    assert out["logits"].shape == (B, S, cfg["vocab_size"])
    assert jnp.isfinite(out["loss"])
    print("KERNEL_OK")
</pallas_src>

<mosaic_0001>
module attributes {stable_mosaic.version = 11 : i64} {
  func.func @_ln_kernel(%arg0: i32, %arg1: memref<16x32xf32, #tpu.memory_space<vmem>>, %arg2: memref<1x32xf32, #tpu.memory_space<vmem>>, %arg3: memref<1x32xf32, #tpu.memory_space<vmem>>, %arg4: memref<16x32xf32, #tpu.memory_space<vmem>>) attributes {dimension_semantics = [#tpu.dimension_semantics<parallel>], iteration_bounds = array<i64: 1>, scalar_prefetch = 0 : i64, scratch_operands = 0 : i64, tpu.core_type = #tpu.core_type<tc>, window_params = [{transform_indices = @transform_0, window_bounds = array<i64: 16, 32>}, {pipeline_mode = #tpu.pipeline_mode<synchronous>, transform_indices = @transform_1, window_bounds = array<i64: 1, 32>}, {pipeline_mode = #tpu.pipeline_mode<synchronous>, transform_indices = @transform_2, window_bounds = array<i64: 1, 32>}, {transform_indices = @transform_3, window_bounds = array<i64: 16, 32>}]} {
    %c0 = arith.constant 0 : index
    %c0_0 = arith.constant 0 : index
    %0 = vector.load %arg1[%c0, %c0_0] : memref<16x32xf32, #tpu.memory_space<vmem>>, vector<16x32xf32>
    %cst = arith.constant dense<0.000000e+00> : vector<16xf32>
    %1 = vector.multi_reduction <add>, %0, %cst [1] : vector<16x32xf32> to vector<16xf32>
    %2 = vector.shape_cast %1 : vector<16xf32> to vector<16x1xf32>
    %cst_1 = arith.constant 3.200000e+01 : f32
    %3 = vector.broadcast %cst_1 : f32 to vector<16x1xf32>
    %4 = arith.divf %2, %3 : vector<16x1xf32>
    %5 = vector.broadcast %4 : vector<16x1xf32> to vector<16x32xf32>
    %6 = arith.subf %0, %5 : vector<16x32xf32>
    %7 = arith.mulf %6, %6 : vector<16x32xf32>
    %cst_2 = arith.constant dense<0.000000e+00> : vector<16xf32>
    %8 = vector.multi_reduction <add>, %7, %cst_2 [1] : vector<16x32xf32> to vector<16xf32>
    %9 = vector.shape_cast %8 : vector<16xf32> to vector<16x1xf32>
    %cst_3 = arith.constant 3.200000e+01 : f32
    %10 = vector.broadcast %cst_3 : f32 to vector<16x1xf32>
    %11 = arith.divf %9, %10 : vector<16x1xf32>
    %cst_4 = arith.constant 9.99999974E-6 : f32
    %12 = vector.broadcast %cst_4 : f32 to vector<16x1xf32>
    %13 = arith.addf %11, %12 : vector<16x1xf32>
    %14 = math.rsqrt %13 : vector<16x1xf32>
    %15 = vector.broadcast %14 : vector<16x1xf32> to vector<16x32xf32>
    %16 = arith.mulf %6, %15 : vector<16x32xf32>
    %c0_5 = arith.constant 0 : index
    %c0_6 = arith.constant 0 : index
    %17 = vector.load %arg2[%c0_5, %c0_6] : memref<1x32xf32, #tpu.memory_space<vmem>>, vector<1x32xf32>
    %18 = vector.broadcast %17 : vector<1x32xf32> to vector<16x32xf32>
    %19 = arith.mulf %16, %18 : vector<16x32xf32>
    %c0_7 = arith.constant 0 : index
    %c0_8 = arith.constant 0 : index
    %20 = vector.load %arg3[%c0_7, %c0_8] : memref<1x32xf32, #tpu.memory_space<vmem>>, vector<1x32xf32>
    %21 = vector.broadcast %20 : vector<1x32xf32> to vector<16x32xf32>
    %22 = arith.addf %19, %21 : vector<16x32xf32>
    %c0_9 = arith.constant 0 : index
    %c0_10 = arith.constant 0 : index
    %23 = vector.load %arg4[%c0_9, %c0_10] : memref<16x32xf32, #tpu.memory_space<vmem>>, vector<16x32xf32>
    tpu.vector_store %arg4[%c0_9, %c0_10], %22 {strides = array<i32>} : memref<16x32xf32, #tpu.memory_space<vmem>>, vector<16x32xf32>,
    return
  }
  func.func @transform_0(%arg0: i32) -> (i32, i32) {
    %c0_i32 = arith.constant 0 : i32
    %c0_i32_0 = arith.constant 0 : i32
    return %arg0, %c0_i32 : i32, i32
  }
  func.func @transform_1(%arg0: i32) -> (i32, i32) {
    %c0_i32 = arith.constant 0 : i32
    %c0_i32_0 = arith.constant 0 : i32
    %c0_i32_1 = arith.constant 0 : i32
    return %c0_i32, %c0_i32_0 : i32, i32
  }
  func.func @transform_2(%arg0: i32) -> (i32, i32) {
    %c0_i32 = arith.constant 0 : i32
    %c0_i32_0 = arith.constant 0 : i32
    %c0_i32_1 = arith.constant 0 : i32
    return %c0_i32, %c0_i32_0 : i32, i32
  }
  func.func @transform_3(%arg0: i32) -> (i32, i32) {
    %c0_i32 = arith.constant 0 : i32
    %c0_i32_0 = arith.constant 0 : i32
    return %arg0, %c0_i32 : i32, i32
  }
}

</mosaic_0001>

<bundles_post_ra>
// kernel: tpu_custom_call.1
= control target key start
LH: loop header
LB: loop body
LE: loop exit
PB: predicated region body
PF: predicated region fallthrough
CT: control target
= control target key end

     0   :  { %8 = vsyncpa [#allocation3], 0  ;;  %s198_s0 = inlined_call_operand.hbm [shape: f32[16,32], index: 0, kind: input, shape index: {}]   ;;  %s199_s1 = inlined_call_operand.vmem [shape: f32[1,32], index: 1, kind: input, shape index: {}]   ;;  %s200_s2 = inlined_call_operand.vmem [shape: f32[1,32], index: 2, kind: input, shape index: {}]   ;;  %s201_s3 = inlined_call_operand.hbm [shape: f32[16,32], index: 3, kind: output, shape index: {}]  }
   0x1   :  { %9 = vsyncpa [#allocation4], 0  ;;  %s150_s12 = smov [#allocation2]  }
   0x2   :  { %s15_s13 = sshll.u32 %s150_s12, 4  ;;  %s16_s13 = int_to_ptr.vmem [resolvable:$true] %s15_s13 }
   0x3   :  { %s114_s14 = scalar_lea.vmem %s16_s13, 256  ;;  %p119_p1 = scmp.lt.s32.totalorder %s16_s13, %s16_s13 }
   0x4   :  { %p115_p0 = scmp.ne.s32.totalorder %s16_s13, %s114_s14  ;;  %p120_p2 = scmp.lt.s32.totalorder %s114_s14, %s114_s14 }
   0x6   :  { %p121_p3 = por %p120_p2, %p119_p1 }
   0x8   :  { %p122_p4 = pnand %p121_p3, %p115_p0 }
   0xa   :  { %125 = shalt.err (!%p122_p4)
}
   0xb   :  { %s151_s15 = smov 128   ;;  %s152_s16 = smov 8  }
   0xc   :  { %21 = dma.hbm_to_vmem [thread:$0]  %s198_s0, 256, %s16_s13, [#allocation3], %s151_s15, %s151_s15, %s152_s16  }
   0xd   :  { %146 = dma.done.wait [#allocation3], 256  }
   0xe   :  { %147 = vsyncadd [#allocation3], 4294967040  ;;  %vm31_vm0 = vcmask 261120   ;;  %v29_v0 = vld [vmem:[#allocation2] sm:$0xff]  ;;  %v30_v1 = vld [vmem:[#allocation2 + $0x8] sm:$0xff]  ;;  %s153_s22 = smov [#allocation5]  }
   0xf   :  { %v32_v2 = vsel %vm31_vm0, %v29_v0, 0.0  ;;  %v35_v3 = vsel %vm31_vm0, %v30_v1, 0.0  ;;  %v96_v21 = vld [vmem:[%s199_s1] ss:$0 sm:$0xff]  ;;  %s84_s23 = sshll.u32 %s153_s22, 4  ;;  %s85_s23 = int_to_ptr.vmem [resolvable:$true] %s84_s23 }
  0x10   :  { %33 = vadd.xlane.f32.xlu0 %v32_v2  ;;  %v97_v23 = vld [vmem:[%s200_s2] ss:$0 sm:$0xff]  ;;  %s126_s24 = scalar_lea.vmem %s85_s23, 256  ;;  %p131_p6 = scmp.lt.s32.totalorder %s85_s23, %s85_s23 }
  0x11   :  { %p127_p5 = scmp.ne.s32.totalorder %s85_s23, %s126_s24  ;;  %p132_p7 = scmp.lt.s32.totalorder %s126_s24, %s126_s24 }
  0x13   :  { %p133_p8 = por %p132_p7, %p131_p6 }
  0x14   :  { %36 = vadd.xlane.f32.xlu0 %v35_v3 }
  0x15   :  { %p134_p9 = pnand %p133_p8, %p127_p5 }
  0x99   :  { %v34_v4 = vpop.xlane.xlu0 %33 }
  0x9a   :  { %v39_v5 = vmul.f32 0.03125, %v34_v4 }
  0x9c   :  { %v41_v6 = vsub.f32 %v29_v0, %v39_v5 }
  0x9d   :  { %v37_v7 = vpop.xlane.xlu0 %36 }
  0x9e   :  { %v40_v8 = vmul.f32 0.03125, %v37_v7  ;;  %v43_v9 = vmul.f32 %v41_v6, %v41_v6 }
  0xa0   :  { %v42_v10 = vsub.f32 %v30_v1, %v40_v8  ;;  %v45_v11 = vsel %vm31_vm0, %v43_v9, 0.0 }
  0xa1   :  { %46 = vadd.xlane.f32.xlu1 %v45_v11 }
  0xa2   :  { %v44_v12 = vmul.f32 %v42_v10, %v42_v10 }
  0xa4   :  { %v48_v13 = vsel %vm31_vm0, %v44_v12, 0.0 }
  0xa5   :  { %49 = vadd.xlane.f32.xlu1 %v48_v13 }
 0x12a   :  { %v47_v14 = vpop.xlane.xlu1 %46 }
 0x12b   :  { %v51_v15 = vmul.f32 0.03125, %v47_v14 }
 0x12d   :  { %v53_v16 = vadd.f32 1e-05, %v51_v15 }
 0x12e   :  { %v50_v17 = vpop.xlane.xlu1 %49 }
 0x12f   :  { %102 = vrsqrt.f32 %v53_v16  ;;  %v52_v18 = vmul.f32 0.03125, %v50_v17 }
 0x131   :  { %v54_v19 = vadd.f32 1e-05, %v52_v18 }
 0x133   :  { %104 = vrsqrt.f32 %v54_v19 }
 0x13c   :  { %v103_v20 = vpop.eup %102 }
 0x13d   :  { %v57_v22 = vmul.f32 %v103_v20, %v41_v6 }
 0x13f   :  { %v66_v24 = vmul.f32 %v96_v21, %v57_v22 }
 0x140   :  { %v105_v25 = vpop.eup %104 }
 0x141   :  { %v58_v26 = vmul.f32 %v105_v25, %v42_v10  ;;  %v75_v27 = vadd.f32 %v97_v23, %v66_v24 }
 0x143   :  { %v67_v28 = vmul.f32 %v96_v21, %v58_v26  ;;  %77 = vst.msk [vmem:[#allocation5] sm:$0xff] %vm31_vm0, %v75_v27 }
 0x145   :  { %v76_v29 = vadd.f32 %v97_v23, %v67_v28 }
 0x147   :  { %78 = vst.msk [vmem:[#allocation5 + $0x8] sm:$0xff] %vm31_vm0, %v76_v29 }
 0x148   :  { %137 = shalt.err (!%p134_p9)
}
 0x149   :  { %90 = dma.vmem_to_hbm [thread:$0]  %s85_s23, 256, %s201_s3, [#allocation4], %s151_s15, %s151_s15, %s152_s16  }
 0x14a   :  { %148 = dma.done.wait [#allocation4], 256  }
 0x14b   :  { %149 = vsyncadd [#allocation4], 4294967040 }
 0x14c   :  { %94 = vsyncpa [#allocation3], 1 }
 0x14d   :  { %95 = vsyncpa [#allocation4], 1 }

</bundles_post_ra>
